<compile_context>
chip_gen: v6e
topology: v6e:2x2x1
jax: 0.10.0
libtpu: 0.0.40
codegen_flags: <defaults>
</compile_context>

<pallas_src>
import functools

import jax
import jax.numpy as jnp
from jax.experimental import pallas as pl
from jax.experimental.pallas import tpu as pltpu

LANE = 128            # TPU lane width: hidden axis padded to this
DEFAULT_TILE_B = 512  # batch-row tile (multiple of 16 for bf16 sublanes); sweepable


def _round_up(n: int, m: int) -> int:
    return ((n + m - 1) // m) * m


def mlp_softmax_kernel(x_ref, w1_ref, b1_ref, w2_ref, b2_ref, o_ref):
    """Fused Linear(32->64) + ReLU + Linear(64->32) + Softmax(dim=1).

    x_ref:  (tile_b, 32)  bf16   - natural (un-padded) input features
    w1_ref: (32, 128)     bf16   - hidden axis zero-padded 64 -> 128
    b1_ref: (1, 128)      f32    - zero in padded hidden lanes
    w2_ref: (128, 32)     bf16   - padded hidden rows are zero -> inert
    b2_ref: (1, 32)       f32
    o_ref:  (tile_b, 32)  f32    - only real output columns are written

    bf16 MXU operands with f32 accumulation; all elementwise / softmax math
    stays f32 (v5e has no bf16 VPU/EUP). Padded hidden lanes give
    ReLU(0 + 0) = 0 and contribute nothing to the second matmul.
    """
    # Layer 1: Linear + ReLU
    h = jnp.dot(x_ref[...], w1_ref[...], preferred_element_type=jnp.float32)
    h = jnp.maximum(h + b1_ref[...], 0.0)

    # Layer 2: Linear (only the 32 real output columns exist)
    logits = jnp.dot(h.astype(jnp.bfloat16), w2_ref[...],
                     preferred_element_type=jnp.float32)
    logits = logits + b2_ref[...]

    # Numerically stable softmax over the feature axis (exact normalization:
    # the divide is a few f32 VPU ops per row and keeps row sums == 1).
    m = jnp.max(logits, axis=-1, keepdims=True)
    e = jnp.exp(logits - m)
    denom = jnp.sum(e, axis=-1, keepdims=True)
    o_ref[...] = (e / denom).astype(o_ref.dtype)


def prepare_params(w1, b1, w2, b2):
    """One-time padding/cast of the constant parameters (do NOT redo per call)."""
    d_in, d_h = w1.shape
    d_out = w2.shape[1]
    d_h_p = _round_up(d_h, LANE)

    w1_p = (jnp.zeros((d_in, d_h_p), jnp.float32)
            .at[:, :d_h].set(w1).astype(jnp.bfloat16))
    b1_p = jnp.zeros((1, d_h_p), jnp.float32).at[:, :d_h].set(b1)
    w2_p = (jnp.zeros((d_h_p, d_out), jnp.float32)
            .at[:d_h, :].set(w2).astype(jnp.bfloat16))
    b2_p = jnp.reshape(b2.astype(jnp.float32), (1, d_out))
    return w1_p, b1_p, w2_p, b2_p


@functools.partial(jax.jit, static_argnames=("tile_b",))
def layered_module_forward(x, w1_p, b1_p, w2_p, b2_p, *, tile_b=DEFAULT_TILE_B):
    """Forward of LayeredModule(Linear(32,64), ReLU(), Linear(64,32))."""
    B, d_in = x.shape
    d_h_p = w1_p.shape[1]
    d_out = w2_p.shape[1]

    # Clamp the batch tile to the (16-aligned) batch so small batches don't
    # over-pad; large batches use the full tile and pl.cdiv sizes the grid.
    tile_b = min(tile_b, _round_up(B, 16))
    b_p = _round_up(B, tile_b)
    num_tiles = pl.cdiv(b_p, tile_b)

    # Cast activations to bf16 in the wrapper; pad batch rows only if needed.
    x_bf = x.astype(jnp.bfloat16)
    x_p = x_bf if b_p == B else (
        jnp.zeros((b_p, d_in), jnp.bfloat16).at[:B, :].set(x_bf))

    cost = pl.CostEstimate(
        flops=2 * b_p * (d_in * d_h_p + d_h_p * d_out),
        transcendentals=b_p * d_out,                       # exp per output elem
        bytes_accessed=(x_p.size * 2                       # bf16 input
                        + w1_p.size * 2 + w2_p.size * 2    # bf16 weights
                        + b1_p.size * 4 + b2_p.size * 4    # f32 biases
                        + b_p * d_out * 4),                # f32 output
    )

    out_p = pl.pallas_call(
        mlp_softmax_kernel,
        out_shape=jax.ShapeDtypeStruct((b_p, d_out), jnp.float32),
        grid=(num_tiles,),
        in_specs=[
            pl.BlockSpec((tile_b, d_in), lambda i: (i, 0)),   # batch-tiled, bf16
            pl.BlockSpec((d_in, d_h_p), lambda i: (0, 0)),    # VMEM-resident
            pl.BlockSpec((1, d_h_p), lambda i: (0, 0)),       # VMEM-resident
            pl.BlockSpec((d_h_p, d_out), lambda i: (0, 0)),   # VMEM-resident
            pl.BlockSpec((1, d_out), lambda i: (0, 0)),       # VMEM-resident
        ],
        out_specs=pl.BlockSpec((tile_b, d_out), lambda i: (i, 0)),
        compiler_params=pltpu.CompilerParams(
            # Only v7x (2 TCs) benefits; ~no-op on single-TC v5e/v6e.
            dimension_semantics=("parallel",),
        ),
        cost_estimate=cost,
    )(x_p, w1_p, b1_p, w2_p, b2_p)

    # Skip the extra XLA slice pass entirely when no batch padding happened.
    return out_p if b_p == B else out_p[:B]


def reference_forward(x, w1, b1, w2, b2):
    h = jnp.maximum(x @ w1 + b1, 0.0)
    logits = h @ w2 + b2
    return jax.nn.softmax(logits, axis=1)


if __name__ == "__main__":
    # Module shapes: in_features=32, hidden=64, out_features=32; batch 256.
    B, D_IN, D_H, D_OUT = 256, 32, 64, 32

    key = jax.random.PRNGKey(0)
    kx, k1, kb1, k2, kb2 = jax.random.split(key, 5)

    # Deterministic PyTorch-Linear-style uniform init (+-1/sqrt(fan_in)).
    x = jax.random.normal(kx, (B, D_IN), dtype=jnp.float32)
    lim1 = 1.0 / jnp.sqrt(D_IN)
    w1 = jax.random.uniform(k1, (D_IN, D_H), minval=-lim1, maxval=lim1,
                            dtype=jnp.float32)
    b1 = jax.random.uniform(kb1, (1, D_H), minval=-lim1, maxval=lim1,
                            dtype=jnp.float32)
    lim2 = 1.0 / jnp.sqrt(D_H)
    w2 = jax.random.uniform(k2, (D_H, D_OUT), minval=-lim2, maxval=lim2,
                            dtype=jnp.float32)
    b2 = jax.random.uniform(kb2, (1, D_OUT), minval=-lim2, maxval=lim2,
                            dtype=jnp.float32)

    # Prepare (pad + cast) constant parameters exactly once.
    params = prepare_params(w1, b1, w2, b2)

    out = layered_module_forward(x, *params)
    out = jax.block_until_ready(out)

    ref = reference_forward(x, w1, b1, w2, b2)
    assert out.shape == (B, D_OUT)
    # bf16 MXU operands -> loosened vs f32-exact; softmax normalization exact.
    assert jnp.allclose(out, ref, atol=5e-3, rtol=5e-2), "mismatch vs reference"
    assert jnp.allclose(jnp.sum(out, axis=1), jnp.ones((B,)), atol=1e-3)

    print("KERNEL_OK")
</pallas_src>

<mosaic_0001>
module attributes {stable_mosaic.version = 11 : i64} {
  func.func @mlp_softmax_kernel(%arg0: i32, %arg1: memref<256x32xbf16, #tpu.memory_space<vmem>>, %arg2: memref<32x128xbf16, #tpu.memory_space<vmem>>, %arg3: memref<1x128xf32, #tpu.memory_space<vmem>>, %arg4: memref<128x32xbf16, #tpu.memory_space<vmem>>, %arg5: memref<1x32xf32, #tpu.memory_space<vmem>>, %arg6: memref<256x32xf32, #tpu.memory_space<vmem>>) attributes {dimension_semantics = [#tpu.dimension_semantics<parallel>], iteration_bounds = array<i64: 1>, scalar_prefetch = 0 : i64, scratch_operands = 0 : i64, tpu.core_type = #tpu.core_type<tc>, window_params = [{transform_indices = @transform_0, window_bounds = array<i64: 256, 32>}, {pipeline_mode = #tpu.pipeline_mode<synchronous>, transform_indices = @transform_1, window_bounds = array<i64: 32, 128>}, {pipeline_mode = #tpu.pipeline_mode<synchronous>, transform_indices = @transform_2, window_bounds = array<i64: 1, 128>}, {pipeline_mode = #tpu.pipeline_mode<synchronous>, transform_indices = @transform_3, window_bounds = array<i64: 128, 32>}, {pipeline_mode = #tpu.pipeline_mode<synchronous>, transform_indices = @transform_4, window_bounds = array<i64: 1, 32>}, {transform_indices = @transform_5, window_bounds = array<i64: 256, 32>}]} {
    %c0 = arith.constant 0 : index
    %c0_0 = arith.constant 0 : index
    %0 = vector.load %arg1[%c0, %c0_0] : memref<256x32xbf16, #tpu.memory_space<vmem>>, vector<256x32xbf16>
    %c0_1 = arith.constant 0 : index
    %c0_2 = arith.constant 0 : index
    %1 = vector.load %arg2[%c0_1, %c0_2] : memref<32x128xbf16, #tpu.memory_space<vmem>>, vector<32x128xbf16>
    %cst = arith.constant dense<0.000000e+00> : vector<256x128xf32>
    %2 = tpu.matmul %0, %1, %cst {dimension_numbers = #tpu.dot_dimension_numbers<[1], [0], [0], [1], [0, 0, 1, 1], [], []>} : vector<256x32xbf16>, vector<32x128xbf16>, vector<256x128xf32> -> vector<256x128xf32>
    %c0_3 = arith.constant 0 : index
    %c0_4 = arith.constant 0 : index
    %3 = vector.load %arg3[%c0_3, %c0_4] : memref<1x128xf32, #tpu.memory_space<vmem>>, vector<1x128xf32>
    %4 = vector.broadcast %3 : vector<1x128xf32> to vector<256x128xf32>
    %5 = arith.addf %2, %4 : vector<256x128xf32>
    %cst_5 = arith.constant 0.000000e+00 : f32
    %6 = vector.broadcast %cst_5 : f32 to vector<256x128xf32>
    %7 = arith.maximumf %5, %6 : vector<256x128xf32>
    %8 = arith.truncf %7 : vector<256x128xf32> to vector<256x128xbf16>
    %c0_6 = arith.constant 0 : index
    %c0_7 = arith.constant 0 : index
    %9 = vector.load %arg4[%c0_6, %c0_7] : memref<128x32xbf16, #tpu.memory_space<vmem>>, vector<128x32xbf16>
    %cst_8 = arith.constant dense<0.000000e+00> : vector<256x32xf32>
    %10 = tpu.matmul %8, %9, %cst_8 {dimension_numbers = #tpu.dot_dimension_numbers<[1], [0], [0], [1], [0, 0, 1, 1], [], []>} : vector<256x128xbf16>, vector<128x32xbf16>, vector<256x32xf32> -> vector<256x32xf32>
    %c0_9 = arith.constant 0 : index
    %c0_10 = arith.constant 0 : index
    %11 = vector.load %arg5[%c0_9, %c0_10] : memref<1x32xf32, #tpu.memory_space<vmem>>, vector<1x32xf32>
    %12 = vector.broadcast %11 : vector<1x32xf32> to vector<256x32xf32>
    %13 = arith.addf %10, %12 : vector<256x32xf32>
    %cst_11 = arith.constant dense<0xFF800000> : vector<256xf32>
    %14 = vector.multi_reduction <maximumf>, %13, %cst_11 [1] : vector<256x32xf32> to vector<256xf32>
    %15 = vector.shape_cast %14 : vector<256xf32> to vector<256x1xf32>
    %16 = vector.broadcast %15 : vector<256x1xf32> to vector<256x32xf32>
    %17 = arith.subf %13, %16 : vector<256x32xf32>
    %18 = math.exp %17 : vector<256x32xf32>
    %cst_12 = arith.constant dense<0.000000e+00> : vector<256xf32>
    %19 = vector.multi_reduction <add>, %18, %cst_12 [1] : vector<256x32xf32> to vector<256xf32>
    %20 = vector.shape_cast %19 : vector<256xf32> to vector<256x1xf32>
    %21 = vector.broadcast %20 : vector<256x1xf32> to vector<256x32xf32>
    %22 = arith.divf %18, %21 : vector<256x32xf32>
    %c0_13 = arith.constant 0 : index
    %c0_14 = arith.constant 0 : index
    %23 = vector.load %arg6[%c0_13, %c0_14] : memref<256x32xf32, #tpu.memory_space<vmem>>, vector<256x32xf32>
    tpu.vector_store %arg6[%c0_13, %c0_14], %22 {strides = array<i32>} : memref<256x32xf32, #tpu.memory_space<vmem>>, vector<256x32xf32>,
    return
  }
  func.func @transform_0(%arg0: i32) -> (i32, i32) {
    %c0_i32 = arith.constant 0 : i32
    %c0_i32_0 = arith.constant 0 : i32
    return %arg0, %c0_i32 : i32, i32
  }
  func.func @transform_1(%arg0: i32) -> (i32, i32) {
    %c0_i32 = arith.constant 0 : i32
    %c0_i32_0 = arith.constant 0 : i32
    %c0_i32_1 = arith.constant 0 : i32
    return %c0_i32, %c0_i32_0 : i32, i32
  }
  func.func @transform_2(%arg0: i32) -> (i32, i32) {
    %c0_i32 = arith.constant 0 : i32
    %c0_i32_0 = arith.constant 0 : i32
    %c0_i32_1 = arith.constant 0 : i32
    return %c0_i32, %c0_i32_0 : i32, i32
  }
  func.func @transform_3(%arg0: i32) -> (i32, i32) {
    %c0_i32 = arith.constant 0 : i32
    %c0_i32_0 = arith.constant 0 : i32
    %c0_i32_1 = arith.constant 0 : i32
    return %c0_i32, %c0_i32_0 : i32, i32
  }
  func.func @transform_4(%arg0: i32) -> (i32, i32) {
    %c0_i32 = arith.constant 0 : i32
    %c0_i32_0 = arith.constant 0 : i32
    %c0_i32_1 = arith.constant 0 : i32
    return %c0_i32, %c0_i32_0 : i32, i32
  }
  func.func @transform_5(%arg0: i32) -> (i32, i32) {
    %c0_i32 = arith.constant 0 : i32
    %c0_i32_0 = arith.constant 0 : i32
    return %arg0, %c0_i32 : i32, i32
  }
}

</mosaic_0001>

<bundles_post_ra>
// kernel: layered_module_forward.1
= control target key start
LH: loop header
LB: loop body
LE: loop exit
PB: predicated region body
PF: predicated region fallthrough
CT: control target
= control target key end

     0   :  { %vm156_vm0 = vcmask 261120   ;;  %s2020_s1 = inlined_call_operand.vmem [shape: bf16[32,128], index: 1, kind: input, shape index: {}]   ;;  %s2021_s0 = inlined_call_operand.vmem [shape: bf16[256,32], index: 0, kind: input, shape index: {}]   ;;  %s2022_s3 = inlined_call_operand.vmem [shape: bf16[128,32], index: 3, kind: input, shape index: {}]   ;;  %s2023_s2 = inlined_call_operand.vmem [shape: f32[1,128], index: 2, kind: input, shape index: {}]   ;;  %s2024_s4 = inlined_call_operand.vmem [shape: f32[1,32], index: 4, kind: input, shape index: {}]   ;;  %s2025_s5 = inlined_call_operand.vmem [shape: f32[256,32], index: 5, kind: output, shape index: {}]  }
   0x1   :  { %v1220_v0 = vld [vmem:[%s2020_s1 + $0x8] sm:$0xff]   ;;  %v1221_v1 = vld [vmem:[%s2020_s1] sm:$0xff]   ;;  %v1224_v4 = vld [vmem:[%s2021_s0 + $0x10] sm:$0xff]  }
   0x2   :  { %1120 = vmatprep.subr.bf16.mxu0 %v1220_v0  ;;  %v1222_v2 = vld [vmem:[%s2021_s0] sm:$0xff]   ;;  %v1223_v3 = vld [vmem:[%s2021_s0 + $0x8] sm:$0xff]   ;;  %v1225_v5 = vld [vmem:[%s2021_s0 + $0x18] sm:$0xff]  }
   0x3   :  { %1121 = vmatpush3.bf16.msra.mxu0 %v1220_v0  ;;  %1124 = vmatprep.mubr.msk.bf16.mxu0 %vm156_vm0, %v1222_v2  ;;  %v1226_v6 = vld [vmem:[%s2021_s0 + $0x20] sm:$0xff]   ;;  %v1238_v7 = vld [vmem:[%s2022_s3 + $0x38] sm:$0xff]   ;;  %v1239_v8 = vld [vmem:[%s2022_s3 + $0x30] sm:$0xff]  }
   0x4   :  { %1122 = vmatprep.subr.bf16.mxu0 %v1221_v1  ;;  %1204 = vmatprep.subr.bf16.mxu1 %v1238_v7  ;;  %v1227_v9 = vld [vmem:[%s2021_s0 + $0x28] sm:$0xff]   ;;  %v1228_v11 = vld [vmem:[%s2021_s0 + $0x30] sm:$0xff]   ;;  %v1241_v12 = vld [vmem:[%s2022_s3 + $0x20] sm:$0xff]  }
   0x5   :  { %1212 = vmatpush3.bf16.msra.mxu1 %v1238_v7  ;;  %v1240_v10 = vld [vmem:[%s2022_s3 + $0x28] sm:$0xff]   ;;  %v1229_v13 = vld [vmem:[%s2021_s0 + $0x38] sm:$0xff]   ;;  %v1230_v15 = vld [vmem:[%s2021_s0 + $0x40] sm:$0xff]  }
   0x6   :  { %1205 = vmatprep.subr.bf16.mxu1 %v1239_v8  ;;  %v1242_v14 = vld [vmem:[%s2022_s3 + $0x18] sm:$0xff]   ;;  %v1243_v16 = vld [vmem:[%s2022_s3 + $0x10] sm:$0xff]   ;;  %v1231_v17 = vld [vmem:[%s2021_s0 + $0x48] sm:$0xff]  }
   0x7   :  { %1123 = vmatpush3.bf16.msra.mxu0 %v1221_v1  ;;  %v1244_v18 = vld [vmem:[%s2022_s3 + $0x8] sm:$0xff]   ;;  %v1232_v19 = vld [vmem:[%s2021_s0 + $0x50] sm:$0xff]   ;;  %v1233_v20 = vld [vmem:[%s2021_s0 + $0x58] sm:$0xff]  }
   0x8   :  { %1156 = vmatprep.subr.bf16.mxu0 %v1238_v7  ;;  %v1234_v21 = vld [vmem:[%s2021_s0 + $0x60] sm:$0xff]   ;;  %v1235_v22 = vld [vmem:[%s2021_s0 + $0x68] sm:$0xff]   ;;  %v1236_v23 = vld [vmem:[%s2021_s0 + $0x70] sm:$0xff]  }
   0x9   :  { %1213 = vmatpush3.bf16.msra.mxu1 %v1239_v8  ;;  %v1237_v24 = vld [vmem:[%s2021_s0 + $0x78] sm:$0xff]   ;;  %v1245_v25 = vld [vmem:[%s2022_s3] sm:$0xff]  }
   0xa   :  { %1125 = vmatmul.mubr.msk.bf16.vlgmr.msra.gmra.mxu0 %vm156_vm0, %v1223_v3  ;;  %1206 = vmatprep.subr.bf16.mxu1 %v1240_v10  ;;  %v1501_v28 = vld [vmem:[%s2023_s2] ss:$0 sm:$0xff] }
   0xb   :  { %1128 = vmatprep.mubr.msk.bf16.mxu0 %vm156_vm0, %v1224_v4  ;;  %1157 = vmatpush3.bf16.msra.mxu0 %v1238_v7 }
   0xc   :  { %1158 = vmatprep.subr.bf16.mxu0 %v1239_v8 }
   0xd   :  { %1214 = vmatpush3.bf16.msra.mxu1 %v1240_v10 }
   0xe   :  { %1207 = vmatprep.subr.bf16.mxu1 %v1241_v12 }
   0xf   :  { %1159 = vmatpush3.bf16.msra.mxu0 %v1239_v8 }
  0x10   :  { %1160 = vmatprep.subr.bf16.mxu0 %v1240_v10 }
  0x11   :  { %1215 = vmatpush3.bf16.msra.mxu1 %v1241_v12 }
  0x12   :  { %1129 = vmatmul.mubr.msk.bf16.gmra.mxu0 %vm156_vm0, %v1225_v5  ;;  %1208 = vmatprep.subr.bf16.mxu1 %v1242_v14 }
  0x13   :  { %1132 = vmatprep.mubr.msk.bf16.mxu0 %vm156_vm0, %v1226_v6  ;;  %1161 = vmatpush3.bf16.msra.mxu0 %v1240_v10 }
  0x14   :  { %1162 = vmatprep.subr.bf16.mxu0 %v1241_v12 }
  0x15   :  { %1216 = vmatpush3.bf16.msra.mxu1 %v1242_v14 }
  0x16   :  { %1209 = vmatprep.subr.bf16.mxu1 %v1243_v16 }
  0x17   :  { %1163 = vmatpush3.bf16.msra.mxu0 %v1241_v12 }
  0x18   :  { %1164 = vmatprep.subr.bf16.mxu0 %v1242_v14 }
  0x19   :  { %1217 = vmatpush3.bf16.msra.mxu1 %v1243_v16 }
  0x1a   :  { %1133 = vmatmul.mubr.msk.bf16.gmra.mxu0 %vm156_vm0, %v1227_v9  ;;  %1210 = vmatprep.subr.bf16.mxu1 %v1244_v18 }
  0x1b   :  { %1136 = vmatprep.mubr.msk.bf16.mxu0 %vm156_vm0, %v1228_v11  ;;  %1165 = vmatpush3.bf16.msra.mxu0 %v1242_v14 }
  0x1c   :  { %1166 = vmatprep.subr.bf16.mxu0 %v1243_v16 }
  0x1d   :  { %1218 = vmatpush3.bf16.msra.mxu1 %v1244_v18 }
  0x1e   :  { %1211 = vmatprep.subr.bf16.mxu1 %v1245_v25 }
  0x1f   :  { %1167 = vmatpush3.bf16.msra.mxu0 %v1243_v16 }
  0x20   :  { %1168 = vmatprep.subr.bf16.mxu0 %v1244_v18 }
  0x21   :  { %1219 = vmatpush3.bf16.msra.mxu1 %v1245_v25 }
  0x22   :  { %1137 = vmatmul.mubr.msk.bf16.gmra.mxu0 %vm156_vm0, %v1229_v13 }
  0x23   :  { %1140 = vmatprep.mubr.msk.bf16.mxu0 %vm156_vm0, %v1230_v15  ;;  %1169 = vmatpush3.bf16.msra.mxu0 %v1244_v18 }
  0x24   :  { %1170 = vmatprep.subr.bf16.mxu0 %v1245_v25 }
  0x27   :  { %1171 = vmatpush3.bf16.msra.mxu0 %v1245_v25 }
  0x2a   :  { %1141 = vmatmul.mubr.msk.bf16.gmra.mxu0 %vm156_vm0, %v1231_v17 }
  0x2b   :  { %1144 = vmatprep.mubr.msk.bf16.mxu0 %vm156_vm0, %v1232_v19 }
  0x32   :  { %1145 = vmatmul.mubr.msk.bf16.gmra.mxu0 %vm156_vm0, %v1233_v20 }
  0x33   :  { %1148 = vmatprep.mubr.msk.bf16.mxu0 %vm156_vm0, %v1234_v21 }
  0x3a   :  { %1149 = vmatmul.mubr.msk.bf16.gmra.mxu0 %vm156_vm0, %v1235_v22 }
  0x3b   :  { %1152 = vmatprep.mubr.msk.bf16.mxu0 %vm156_vm0, %v1236_v23 }
  0x42   :  { %1153 = vmatmul.mubr.msk.bf16.gmra.mxu0 %vm156_vm0, %v1237_v24 }
  0xca   :  { %v1126_v26 = vpop.f32.mrf.mxu0 }
  0xcb   :  { %v248_v32 = vadd.f32 %v1126_v26, %v1501_v28 }
  0xcc   :  { %v239_v27 = vpop.f32.mrf.mxu0 }
  0xcd   :  { %v240_v30 = vadd.f32 %v1501_v28, %v239_v27  ;;  %v368_v39 = vmax.f32 %v248_v32, 0.0 }
  0xce   :  { %v1127_v29 = vpop.f32.mrf.mxu0 }
  0xcf   :  { %v251_v31 = vadd.f32 %v1127_v29, %v1501_v28  ;;  %v366_v37 = vmax.f32 %v240_v30, 0.0 }
  0xd0   :  { %v242_v33 = vpop.f32.mrf.mxu0 }
  0xd1   :  { %v243_v34 = vadd.f32 %v1501_v28, %v242_v33  ;;  %v369_v35 = vmax.f32 %v251_v31, 0.0 }
  0xd2   :  { %v1130_v36 = vpop.f32.mrf.mxu0 }
  0xd3   :  { %v367_v38 = vmax.f32 %v243_v34, 0.0  ;;  %v399_v42 = vpack.c.bf16 %v369_v35, %v368_v39  ;;  %v264_v46 = vadd.f32 %v1130_v36, %v1501_v28 }
  0xd4   :  { %v255_v40 = vpop.f32.mrf.mxu0 }
  0xd5   :  { %v398_v41 = vpack.c.bf16 %v367_v38, %v366_v37  ;;  %v256_v44 = vadd.f32 %v1501_v28, %v255_v40  ;;  %v372_v53 = vmax.f32 %v264_v46, 0.0 }
  0xd6   :  { %v1131_v43 = vpop.f32.mrf.mxu0 }
  0xd7   :  { %v267_v45 = vadd.f32 %v1131_v43, %v1501_v28  ;;  %1172 = vmatprep.mubr.bf16.mxu0 %v398_v41  ;;  %v370_v51 = vmax.f32 %v256_v44, 0.0 }
  0xd8   :  { %v258_v47 = vpop.f32.mrf.mxu0  ;;  %1173 = vmatmul.mubr.bf16.vlgmr.msra.gmra.mxu0 %v399_v42 }
  0xd9   :  { %v259_v48 = vadd.f32 %v1501_v28, %v258_v47  ;;  %v373_v49 = vmax.f32 %v267_v45, 0.0 }
  0xda   :  { %v1134_v50 = vpop.f32.mrf.mxu0 }
  0xdb   :  { %v371_v52 = vmax.f32 %v259_v48, 0.0  ;;  %v401_v56 = vpack.c.bf16 %v373_v49, %v372_v53  ;;  %v280_v60 = vadd.f32 %v1134_v50, %v1501_v28 }
  0xdc   :  { %v271_v54 = vpop.f32.mrf.mxu0 }
  0xdd   :  { %v400_v55 = vpack.c.bf16 %v371_v52, %v370_v51  ;;  %v272_v58 = vadd.f32 %v1501_v28, %v271_v54  ;;  %v376_v3 = vmax.f32 %v280_v60, 0.0 }
  0xde   :  { %v1135_v57 = vpop.f32.mrf.mxu0 }
  0xdf   :  { %v283_v59 = vadd.f32 %v1135_v57, %v1501_v28  ;;  %1176 = vmatprep.mubr.bf16.mxu1 %v400_v55  ;;  %v374_v1 = vmax.f32 %v272_v58, 0.0 }
  0xe0   :  { %v274_v61 = vpop.f32.mrf.mxu0  ;;  %1177 = vmatmul.mubr.bf16.vlgmr.msra.gmra.mxu1 %v401_v56 }
  0xe1   :  { %v275_v62 = vadd.f32 %v1501_v28, %v274_v61  ;;  %v377_v63 = vmax.f32 %v283_v59, 0.0 }
  0xe2   :  { %v1138_v0 = vpop.f32.mrf.mxu0 }
  0xe3   :  { %v375_v2 = vmax.f32 %v275_v62, 0.0  ;;  %v403_v6 = vpack.c.bf16 %v377_v63, %v376_v3  ;;  %v296_v10 = vadd.f32 %v1138_v0, %v1501_v28 }
  0xe4   :  { %v287_v4 = vpop.f32.mrf.mxu0 }
  0xe5   :  { %v402_v5 = vpack.c.bf16 %v375_v2, %v374_v1  ;;  %v288_v8 = vadd.f32 %v1501_v28, %v287_v4  ;;  %v380_v17 = vmax.f32 %v296_v10, 0.0 }
  0xe6   :  { %v1139_v7 = vpop.f32.mrf.mxu0 }
  0xe7   :  { %v299_v9 = vadd.f32 %v1139_v7, %v1501_v28  ;;  %1180 = vmatprep.mubr.bf16.mxu1 %v402_v5  ;;  %v378_v15 = vmax.f32 %v288_v8, 0.0 }
  0xe8   :  { %v290_v11 = vpop.f32.mrf.mxu0  ;;  %1181 = vmatmul.mubr.bf16.gmra.mxu1 %v403_v6 }
  0xe9   :  { %v291_v12 = vadd.f32 %v1501_v28, %v290_v11  ;;  %v381_v13 = vmax.f32 %v299_v9, 0.0 }
  0xea   :  { %v1142_v14 = vpop.f32.mrf.mxu0 }
  0xeb   :  { %v379_v16 = vmax.f32 %v291_v12, 0.0  ;;  %v405_v20 = vpack.c.bf16 %v381_v13, %v380_v17  ;;  %v312_v24 = vadd.f32 %v1142_v14, %v1501_v28  ;;  %v1538_v12 = vld [vmem:[%s2024_s4] ss:$0 sm:$0xff] }
  0xec   :  { %v303_v18 = vpop.f32.mrf.mxu0 }
  0xed   :  { %v404_v19 = vpack.c.bf16 %v379_v16, %v378_v15  ;;  %v304_v22 = vadd.f32 %v1501_v28, %v303_v18  ;;  %v384_v32 = vmax.f32 %v312_v24, 0.0 }
  0xee   :  { %v1143_v21 = vpop.f32.mrf.mxu0 }
  0xef   :  { %v315_v23 = vadd.f32 %v1143_v21, %v1501_v28  ;;  %1184 = vmatprep.mubr.bf16.mxu1 %v404_v19  ;;  %v382_v30 = vmax.f32 %v304_v22, 0.0 }
  0xf0   :  { %v306_v25 = vpop.f32.mrf.mxu0  ;;  %1185 = vmatmul.mubr.bf16.gmra.mxu1 %v405_v20 }
  0xf1   :  { %v307_v26 = vadd.f32 %v1501_v28, %v306_v25  ;;  %v385_v27 = vmax.f32 %v315_v23, 0.0 }
  0xf2   :  { %v1146_v29 = vpop.f32.mrf.mxu0 }
  0xf3   :  { %v383_v31 = vmax.f32 %v307_v26, 0.0  ;;  %v407_v35 = vpack.c.bf16 %v385_v27, %v384_v32  ;;  %v328_v39 = vadd.f32 %v1146_v29, %v1501_v28 }
  0xf4   :  { %v319_v33 = vpop.f32.mrf.mxu0 }
  0xf5   :  { %v406_v34 = vpack.c.bf16 %v383_v31, %v382_v30  ;;  %v320_v37 = vadd.f32 %v1501_v28, %v319_v33  ;;  %v388_v46 = vmax.f32 %v328_v39, 0.0 }
  0xf6   :  { %v1147_v36 = vpop.f32.mrf.mxu0 }
  0xf7   :  { %v331_v38 = vadd.f32 %v1147_v36, %v1501_v28  ;;  %1188 = vmatprep.mubr.bf16.mxu1 %v406_v34  ;;  %v386_v44 = vmax.f32 %v320_v37, 0.0 }
  0xf8   :  { %v322_v40 = vpop.f32.mrf.mxu0  ;;  %1189 = vmatmul.mubr.bf16.gmra.mxu1 %v407_v35 }
  0xf9   :  { %v323_v41 = vadd.f32 %v1501_v28, %v322_v40  ;;  %v389_v42 = vmax.f32 %v331_v38, 0.0 }
  0xfa   :  { %v1150_v43 = vpop.f32.mrf.mxu0 }
  0xfb   :  { %v387_v45 = vmax.f32 %v323_v41, 0.0  ;;  %v409_v49 = vpack.c.bf16 %v389_v42, %v388_v46  ;;  %v344_v53 = vadd.f32 %v1150_v43, %v1501_v28 }
  0xfc   :  { %v335_v47 = vpop.f32.mrf.mxu0 }
  0xfd   :  { %v408_v48 = vpack.c.bf16 %v387_v45, %v386_v44  ;;  %v336_v51 = vadd.f32 %v1501_v28, %v335_v47  ;;  %v392_v60 = vmax.f32 %v344_v53, 0.0 }
  0xfe   :  { %v1151_v50 = vpop.f32.mrf.mxu0 }
  0xff   :  { %v347_v52 = vadd.f32 %v1151_v50, %v1501_v28  ;;  %1192 = vmatprep.mubr.bf16.mxu1 %v408_v48  ;;  %v390_v58 = vmax.f32 %v336_v51, 0.0 }
 0x100   :  { %v338_v54 = vpop.f32.mrf.mxu0  ;;  %1193 = vmatmul.mubr.bf16.gmra.mxu1 %v409_v49 }
 0x101   :  { %v339_v55 = vadd.f32 %v1501_v28, %v338_v54  ;;  %v393_v56 = vmax.f32 %v347_v52, 0.0 }
 0x102   :  { %v1154_v57 = vpop.f32.mrf.mxu0 }
 0x103   :  { %v391_v59 = vmax.f32 %v339_v55, 0.0  ;;  %v411_v63 = vpack.c.bf16 %v393_v56, %v392_v60  ;;  %v360_v3 = vadd.f32 %v1154_v57, %v1501_v28 }
 0x104   :  { %v351_v61 = vpop.f32.mrf.mxu0 }
 0x105   :  { %v410_v62 = vpack.c.bf16 %v391_v59, %v390_v58  ;;  %v352_v1 = vadd.f32 %v1501_v28, %v351_v61  ;;  %v396_v9 = vmax.f32 %v360_v3, 0.0 }
 0x106   :  { %v1155_v0 = vpop.f32.mrf.mxu0 }
 0x107   :  { %v363_v2 = vadd.f32 %v1155_v0, %v1501_v28  ;;  %1196 = vmatprep.mubr.bf16.mxu1 %v410_v62  ;;  %v394_v7 = vmax.f32 %v352_v1, 0.0 }
 0x108   :  { %v354_v4 = vpop.f32.mrf.mxu0  ;;  %1197 = vmatmul.mubr.bf16.gmra.mxu1 %v411_v63 }
 0x109   :  { %v355_v5 = vadd.f32 %v1501_v28, %v354_v4  ;;  %v397_v6 = vmax.f32 %v363_v2, 0.0 }
 0x10b   :  { %v395_v8 = vmax.f32 %v355_v5, 0.0  ;;  %v413_v11 = vpack.c.bf16 %v397_v6, %v396_v9 }
 0x10d   :  { %v412_v10 = vpack.c.bf16 %v395_v8, %v394_v7 }
 0x10f   :  { %1200 = vmatprep.mubr.bf16.mxu1 %v412_v10 }
 0x110   :  { %1201 = vmatmul.mubr.bf16.gmra.mxu1 %v413_v11 }
 0x198   :  { %v1174_v13 = vpop.f32.mrf.mxu0 }
 0x199   :  { %v1541_v14 = vadd.f32 %v1174_v13, %v1538_v12 }
 0x19a   :  { %v519_v15 = vpop.f32.mrf.mxu0 }
 0x19b   :  { %v1544_v28 = vadd.f32 %v1538_v12, %v519_v15  ;;  %v652_v16 = vsel %vm156_vm0, %v1541_v14, -inf }
 0x19c   :  { %653 = vmax.xlane.f32.xlu1 %v652_v16  ;;  %v1175_v17 = vpop.f32.mrf.mxu0 }
 0x19d   :  { %v1549_v18 = vadd.f32 %v1175_v17, %v1538_v12  ;;  %v646_v19 = vsel %vm156_vm0, %v1544_v28, -inf }
 0x19e   :  { %v522_v20 = vpop.f32.mrf.mxu0  ;;  %647 = vmax.xlane.f32.xlu0 %v646_v19 }
 0x19f   :  { %v1554_v21 = vadd.f32 %v1538_v12, %v522_v20  ;;  %v655_v22 = vsel %vm156_vm0, %v1549_v18, -inf }
 0x1a0   :  { %v1178_v23 = vpop.f32.mrf.mxu1  ;;  %656 = vmax.xlane.f32.xlu1 %v655_v22 }
 0x1a1   :  { %v1559_v24 = vadd.f32 %v1178_v23, %v1538_v12  ;;  %v649_v25 = vsel %vm156_vm0, %v1554_v21, -inf }
 0x1a2   :  { %v535_v26 = vpop.f32.mrf.mxu1  ;;  %650 = vmax.xlane.f32.xlu0 %v649_v25 }
 0x1a3   :  { %v1564_v29 = vadd.f32 %v1538_v12, %v535_v26  ;;  %v664_v31 = vsel %vm156_vm0, %v1559_v24, -inf }
 0x1a4   :  { %v1179_v27 = vpop.f32.mrf.mxu1 }
 0x1a5   :  { %v1567_v30 = vadd.f32 %v1179_v27, %v1538_v12  ;;  %v658_v37 = vsel %vm156_vm0, %v1564_v29, -inf }
 0x1a6   :  { %v538_v32 = vpop.f32.mrf.mxu1  ;;  %665 = vmax.xlane.f32.xlu0 %v664_v31 }
 0x1a7   :  { %v1572_v33 = vadd.f32 %v1538_v12, %v538_v32  ;;  %v667_v34 = vsel %vm156_vm0, %v1567_v30, -inf }
 0x1a8   :  { %v1182_v35 = vpop.f32.mrf.mxu1  ;;  %668 = vmax.xlane.f32.xlu1 %v667_v34 }
 0x1a9   :  { %v1577_v36 = vadd.f32 %v1182_v35, %v1538_v12  ;;  %v661_v39 = vsel %vm156_vm0, %v1572_v33, -inf }
 0x1aa   :  { %v551_v38 = vpop.f32.mrf.mxu1  ;;  %659 = vmax.xlane.f32.xlu0 %v658_v37 }
 0x1ab   :  { %v1584_v41 = vadd.f32 %v1538_v12, %v551_v38  ;;  %v676_v43 = vsel %vm156_vm0, %v1577_v36, -inf }
 0x1ac   :  { %v1183_v40 = vpop.f32.mrf.mxu1  ;;  %662 = vmax.xlane.f32.xlu1 %v661_v39 }
 0x1ad   :  { %v1587_v42 = vadd.f32 %v1183_v40, %v1538_v12  ;;  %v670_v49 = vsel %vm156_vm0, %v1584_v41, -inf }
 0x1ae   :  { %v554_v44 = vpop.f32.mrf.mxu1  ;;  %677 = vmax.xlane.f32.xlu0 %v676_v43 }
 0x1af   :  { %v1592_v45 = vadd.f32 %v1538_v12, %v554_v44  ;;  %v679_v46 = vsel %vm156_vm0, %v1587_v42, -inf }
 0x1b0   :  { %v1186_v47 = vpop.f32.mrf.mxu1  ;;  %680 = vmax.xlane.f32.xlu1 %v679_v46 }
 0x1b1   :  { %v1597_v48 = vadd.f32 %v1186_v47, %v1538_v12  ;;  %v673_v51 = vsel %vm156_vm0, %v1592_v45, -inf }
 0x1b2   :  { %v567_v50 = vpop.f32.mrf.mxu1  ;;  %671 = vmax.xlane.f32.xlu0 %v670_v49 }
 0x1b3   :  { %v1604_v53 = vadd.f32 %v1538_v12, %v567_v50  ;;  %v688_v55 = vsel %vm156_vm0, %v1597_v48, -inf }
 0x1b4   :  { %v1187_v52 = vpop.f32.mrf.mxu1  ;;  %674 = vmax.xlane.f32.xlu1 %v673_v51 }
 0x1b5   :  { %v1607_v54 = vadd.f32 %v1187_v52, %v1538_v12  ;;  %v682_v61 = vsel %vm156_vm0, %v1604_v53, -inf }
 0x1b6   :  { %v570_v56 = vpop.f32.mrf.mxu1  ;;  %689 = vmax.xlane.f32.xlu0 %v688_v55 }
 0x1b7   :  { %v1612_v57 = vadd.f32 %v1538_v12, %v570_v56  ;;  %v691_v58 = vsel %vm156_vm0, %v1607_v54, -inf }
 0x1b8   :  { %v1190_v59 = vpop.f32.mrf.mxu1  ;;  %692 = vmax.xlane.f32.xlu1 %v691_v58 }
 0x1b9   :  { %v1617_v60 = vadd.f32 %v1190_v59, %v1538_v12  ;;  %v685_v63 = vsel %vm156_vm0, %v1612_v57, -inf }
 0x1ba   :  { %v583_v62 = vpop.f32.mrf.mxu1  ;;  %683 = vmax.xlane.f32.xlu0 %v682_v61 }
 0x1bb   :  { %v1624_v1 = vadd.f32 %v1538_v12, %v583_v62  ;;  %v700_v3 = vsel %vm156_vm0, %v1617_v60, -inf }
 0x1bc   :  { %v1191_v0 = vpop.f32.mrf.mxu1  ;;  %686 = vmax.xlane.f32.xlu1 %v685_v63 }
 0x1bd   :  { %v1627_v2 = vadd.f32 %v1191_v0, %v1538_v12  ;;  %v694_v9 = vsel %vm156_vm0, %v1624_v1, -inf }
 0x1be   :  { %v586_v4 = vpop.f32.mrf.mxu1  ;;  %701 = vmax.xlane.f32.xlu0 %v700_v3 }
 0x1bf   :  { %v1632_v5 = vadd.f32 %v1538_v12, %v586_v4  ;;  %v703_v6 = vsel %vm156_vm0, %v1627_v2, -inf }
 0x1c0   :  { %v1194_v7 = vpop.f32.mrf.mxu1  ;;  %704 = vmax.xlane.f32.xlu1 %v703_v6 }
 0x1c1   :  { %v1637_v8 = vadd.f32 %v1194_v7, %v1538_v12  ;;  %v697_v11 = vsel %vm156_vm0, %v1632_v5, -inf }
 0x1c2   :  { %v599_v10 = vpop.f32.mrf.mxu1  ;;  %695 = vmax.xlane.f32.xlu0 %v694_v9 }
 0x1c3   :  { %v1644_v15 = vadd.f32 %v1538_v12, %v599_v10  ;;  %v712_v17 = vsel %vm156_vm0, %v1637_v8, -inf }
 0x1c4   :  { %v1195_v13 = vpop.f32.mrf.mxu1  ;;  %698 = vmax.xlane.f32.xlu1 %v697_v11 }
 0x1c5   :  { %v1647_v16 = vadd.f32 %v1195_v13, %v1538_v12  ;;  %v706_v26 = vsel %vm156_vm0, %v1644_v15, -inf }
 0x1c6   :  { %v602_v19 = vpop.f32.mrf.mxu1  ;;  %713 = vmax.xlane.f32.xlu0 %v712_v17 }
 0x1c7   :  { %v1652_v20 = vadd.f32 %v1538_v12, %v602_v19  ;;  %v715_v22 = vsel %vm156_vm0, %v1647_v16, -inf }
 0x1c8   :  { %v1198_v23 = vpop.f32.mrf.mxu1  ;;  %716 = vmax.xlane.f32.xlu1 %v715_v22 }
 0x1c9   :  { %v1657_v25 = vadd.f32 %v1198_v23, %v1538_v12  ;;  %v709_v31 = vsel %vm156_vm0, %v1652_v20, -inf }
 0x1ca   :  { %v615_v27 = vpop.f32.mrf.mxu1  ;;  %707 = vmax.xlane.f32.xlu0 %v706_v26 }
 0x1cb   :  { %v1664_v34 = vadd.f32 %v1538_v12, %v615_v27  ;;  %v724_v37 = vsel %vm156_vm0, %v1657_v25, -inf }
 0x1cc   :  { %v1199_v32 = vpop.f32.mrf.mxu1  ;;  %710 = vmax.xlane.f32.xlu1 %v709_v31 }
 0x1cd   :  { %v1667_v35 = vadd.f32 %v1199_v32, %v1538_v12  ;;  %v718_v44 = vsel %vm156_vm0, %v1664_v34, -inf }
 0x1ce   :  { %v618_v38 = vpop.f32.mrf.mxu1  ;;  %725 = vmax.xlane.f32.xlu0 %v724_v37 }
 0x1cf   :  { %v1672_v39 = vadd.f32 %v1538_v12, %v618_v38  ;;  %v727_v40 = vsel %vm156_vm0, %v1667_v35, -inf }
 0x1d0   :  { %v1202_v43 = vpop.f32.mrf.mxu1  ;;  %728 = vmax.xlane.f32.xlu1 %v727_v40 }
 0x1d1   :  { %v721_v49 = vsel %vm156_vm0, %v1672_v39, -inf  ;;  %v1684_v51 = vadd.f32 %v1202_v43, %v1538_v12 }
 0x1d2   :  { %v631_v46 = vpop.f32.mrf.mxu1  ;;  %719 = vmax.xlane.f32.xlu0 %v718_v44 }
 0x1d3   :  { %v1679_v47 = vadd.f32 %v1538_v12, %v631_v46  ;;  %v736_v61 = vsel %vm156_vm0, %v1684_v51, -inf }
 0x1d4   :  { %v1203_v50 = vpop.f32.mrf.mxu1  ;;  %722 = vmax.xlane.f32.xlu1 %v721_v49 }
 0x1d5   :  { %v730_v52 = vsel %vm156_vm0, %v1679_v47, -inf  ;;  %v1692_v58 = vadd.f32 %v1203_v50, %v1538_v12 }
 0x1d6   :  { %v634_v55 = vpop.f32.mrf.mxu1  ;;  %731 = vmax.xlane.f32.xlu0 %v730_v52 }
 0x1d7   :  { %v1689_v56 = vadd.f32 %v1538_v12, %v634_v55  ;;  %v739_v62 = vsel %vm156_vm0, %v1692_v58, -inf }
 0x1d9   :  { %v733_v59 = vsel %vm156_vm0, %v1689_v56, -inf }
 0x1da   :  { %734 = vmax.xlane.f32.xlu1 %v733_v59  ;;  %737 = vmax.xlane.f32.xlu0 %v736_v61 }
 0x1de   :  { %740 = vmax.xlane.f32.xlu1 %v739_v62 }
 0x225   :  { %v654_v63 = vpop.xlane.xlu1 %653 }
 0x226   :  { %v744_v0 = vsub.f32 %v1541_v14, %v654_v63 }
 0x227   :  { %v648_v3 = vpop.xlane.xlu0 %647 }
 0x228   :  { %v778_v4 = vmul.f32 1.442695, %v744_v0  ;;  %v742_v12 = vsub.f32 %v1544_v28, %v648_v3 }
 0x229   :  { %v657_v6 = vpop.xlane.xlu1 %656 }
 0x22a   :  { %1246 = vpow2.f32 %v778_v4  ;;  %v774_v7 = vmul.f32 1.442695, %v742_v12  ;;  %v745_v9 = vsub.f32 %v1549_v18, %v657_v6 }
 0x22b   :  { %v651_v10 = vpop.xlane.xlu0 %650 }
 0x22c   :  { %1248 = vpow2.f32 %v774_v7  ;;  %v780_v11 = vmul.f32 1.442695, %v745_v9  ;;  %v743_v13 = vsub.f32 %v1554_v21, %v651_v10 }
 0x22e   :  { %1250 = vpow2.f32 %v780_v11  ;;  %v776_v17 = vmul.f32 1.442695, %v743_v13 }
 0x22f   :  { %v666_v19 = vpop.xlane.xlu0 %665 }
 0x230   :  { %1252 = vpow2.f32 %v776_v17  ;;  %v748_v14 = vsub.f32 %v1559_v24, %v666_v19 }
 0x231   :  { %v669_v22 = vpop.xlane.xlu1 %668 }
 0x232   :  { %v786_v23 = vmul.f32 1.442695, %v748_v14  ;;  %v749_v28 = vsub.f32 %v1567_v30, %v669_v22 }
 0x233   :  { %v660_v26 = vpop.xlane.xlu0 %659 }
 0x234   :  { %1254 = vpow2.f32 %v786_v23  ;;  %v788_v27 = vmul.f32 1.442695, %v749_v28  ;;  %v746_v18 = vsub.f32 %v1564_v29, %v660_v26 }
 0x235   :  { %v663_v31 = vpop.xlane.xlu1 %662 }
 0x236   :  { %1256 = vpow2.f32 %v788_v27  ;;  %v782_v32 = vmul.f32 1.442695, %v746_v18  ;;  %v747_v21 = vsub.f32 %v1572_v33, %v663_v31 }
 0x237   :  { %v1708_v37 = vpop.eup %1246  ;;  %v678_v38 = vpop.xlane.xlu0 %677 }
 0x238   :  { %1258 = vpow2.f32 %v782_v32  ;;  %v784_v40 = vmul.f32 1.442695, %v747_v21  ;;  %v752_v24 = vsub.f32 %v1577_v36, %v678_v38  ;;  %v844_v30 = vsel %vm156_vm0, %v1708_v37, 0.0 }
 0x239   :  { %v1713_v43 = vpop.eup %1248  ;;  %v681_v44 = vpop.xlane.xlu1 %680  ;;  %845 = vadd.xlane.f32.xlu0 %v844_v30 }
 0x23a   :  { %1260 = vpow2.f32 %v784_v40  ;;  %v794_v29 = vmul.f32 1.442695, %v752_v24  ;;  %v753_v46 = vsub.f32 %v1587_v42, %v681_v44  ;;  %v838_v50 = vsel %vm156_vm0, %v1713_v43, 0.0 }
 0x23b   :  { %v1716_v49 = vpop.eup %1250  ;;  %v672_v33 = vpop.xlane.xlu0 %671 }
 0x23c   :  { %1262 = vpow2.f32 %v794_v29  ;;  %v796_v52 = vmul.f32 1.442695, %v753_v46  ;;  %v750_v36 = vsub.f32 %v1584_v41, %v672_v33  ;;  %v847_v55 = vsel %vm156_vm0, %v1716_v49, 0.0 }
 0x23d   :  { %v1723_v59 = vpop.eup %1252  ;;  %848 = vadd.xlane.f32.xlu1 %v847_v55  ;;  %v675_v61 = vpop.xlane.xlu1 %674  ;;  %839 = vadd.xlane.f32.xlu0 %v838_v50 }
 0x23e   :  { %1264 = vpow2.f32 %v796_v52  ;;  %v790_v42 = vmul.f32 1.442695, %v750_v36  ;;  %v751_v62 = vsub.f32 %v1592_v45, %v675_v61  ;;  %v841_v41 = vsel %vm156_vm0, %v1723_v59, 0.0 }
 0x23f   :  { %v690_v63 = vpop.xlane.xlu0 %689 }
 0x240   :  { %1266 = vpow2.f32 %v790_v42  ;;  %v792_v0 = vmul.f32 1.442695, %v751_v62  ;;  %v756_v3 = vsub.f32 %v1597_v48, %v690_v63 }
 0x241   :  { %v1729_v4 = vpop.eup %1254  ;;  %v693_v12 = vpop.xlane.xlu1 %692  ;;  %842 = vadd.xlane.f32.xlu1 %v841_v41 }
 0x242   :  { %1268 = vpow2.f32 %v792_v0  ;;  %v802_v6 = vmul.f32 1.442695, %v756_v3  ;;  %v757_v7 = vsub.f32 %v1607_v54, %v693_v12  ;;  %v856_v9 = vsel %vm156_vm0, %v1729_v4, 0.0 }
 0x243   :  { %v1734_v45 = vpop.eup %1256  ;;  %857 = vadd.xlane.f32.xlu0 %v856_v9  ;;  %v684_v10 = vpop.xlane.xlu0 %683 }
 0x244   :  { %1270 = vpow2.f32 %v802_v6  ;;  %v804_v48 = vmul.f32 1.442695, %v757_v7  ;;  %v754_v11 = vsub.f32 %v1604_v53, %v684_v10  ;;  %v859_v13 = vsel %vm156_vm0, %v1734_v45, 0.0 }
 0x245   :  { %v1739_v17 = vpop.eup %1258  ;;  %v687_v19 = vpop.xlane.xlu1 %686  ;;  %860 = vadd.xlane.f32.xlu1 %v859_v13 }
 0x246   :  { %1272 = vpow2.f32 %v804_v48  ;;  %v798_v54 = vmul.f32 1.442695, %v754_v11  ;;  %v755_v14 = vsub.f32 %v1612_v57, %v687_v19  ;;  %v850_v22 = vsel %vm156_vm0, %v1739_v17, 0.0 }
 0x247   :  { %v1744_v23 = vpop.eup %1260  ;;  %851 = vadd.xlane.f32.xlu0 %v850_v22  ;;  %v702_v28 = vpop.xlane.xlu0 %701 }
 0x248   :  { %1274 = vpow2.f32 %v798_v54  ;;  %v800_v53 = vmul.f32 1.442695, %v755_v14  ;;  %v760_v26 = vsub.f32 %v1617_v60, %v702_v28  ;;  %v853_v27 = vsel %vm156_vm0, %v1744_v23, 0.0 }
 0x249   :  { %v1749_v18 = vpop.eup %1262  ;;  %v705_v31 = vpop.xlane.xlu1 %704  ;;  %854 = vadd.xlane.f32.xlu1 %v853_v27 }
 0x24a   :  { %1276 = vpow2.f32 %v800_v53  ;;  %v810_v57 = vmul.f32 1.442695, %v760_v26  ;;  %v761_v32 = vsub.f32 %v1627_v2, %v705_v31  ;;  %v868_v21 = vsel %vm156_vm0, %v1749_v18, 0.0 }
 0x24b   :  { %v1754_v38 = vpop.eup %1264  ;;  %869 = vadd.xlane.f32.xlu0 %v868_v21  ;;  %v696_v40 = vpop.xlane.xlu0 %695 }
 0x24c   :  { %1278 = vpow2.f32 %v810_v57  ;;  %v812_v60 = vmul.f32 1.442695, %v761_v32  ;;  %v758_v24 = vsub.f32 %v1624_v1, %v696_v40  ;;  %v871_v30 = vsel %vm156_vm0, %v1754_v38, 0.0 }
 0x24d   :  { %v1759_v44 = vpop.eup %1266  ;;  %v699_v29 = vpop.xlane.xlu1 %698  ;;  %872 = vadd.xlane.f32.xlu1 %v871_v30 }
 0x24e   :  { %1280 = vpow2.f32 %v812_v60  ;;  %v806_v2 = vmul.f32 1.442695, %v758_v24  ;;  %v759_v46 = vsub.f32 %v1632_v5, %v699_v29  ;;  %v862_v33 = vsel %vm156_vm0, %v1759_v44, 0.0 }
 0x24f   :  { %v1764_v50 = vpop.eup %1268  ;;  %863 = vadd.xlane.f32.xlu0 %v862_v33  ;;  %v714_v52 = vpop.xlane.xlu0 %713 }
 0x250   :  { %1282 = vpow2.f32 %v806_v2  ;;  %v808_v1 = vmul.f32 1.442695, %v759_v46  ;;  %v764_v36 = vsub.f32 %v1637_v8, %v714_v52  ;;  %v865_v55 = vsel %vm156_vm0, %v1764_v50, 0.0 }
 0x251   :  { %v1769_v61 = vpop.eup %1270  ;;  %v717_v42 = vpop.xlane.xlu1 %716  ;;  %866 = vadd.xlane.f32.xlu1 %v865_v55 }
 0x252   :  { %1284 = vpow2.f32 %v808_v1  ;;  %v818_v5 = vmul.f32 1.442695, %v764_v36  ;;  %v765_v62 = vsub.f32 %v1647_v16, %v717_v42  ;;  %v880_v63 = vsel %vm156_vm0, %v1769_v61, 0.0 }
 0x253   :  { %v1774_v0 = vpop.eup %1272  ;;  %881 = vadd.xlane.f32.xlu0 %v880_v63  ;;  %v708_v3 = vpop.xlane.xlu0 %707 }
 0x254   :  { %1286 = vpow2.f32 %v818_v5  ;;  %v820_v8 = vmul.f32 1.442695, %v765_v62  ;;  %v762_v41 = vsub.f32 %v1644_v15, %v708_v3  ;;  %v883_v12 = vsel %vm156_vm0, %v1774_v0, 0.0 }
 0x255   :  { %v1779_v6 = vpop.eup %1274  ;;  %v711_v7 = vpop.xlane.xlu1 %710  ;;  %884 = vadd.xlane.f32.xlu1 %v883_v12 }
 0x256   :  { %1288 = vpow2.f32 %v820_v8  ;;  %v814_v16 = vmul.f32 1.442695, %v762_v41  ;;  %v763_v9 = vsub.f32 %v1652_v20, %v711_v7  ;;  %v874_v10 = vsel %vm156_vm0, %v1779_v6, 0.0 }
 0x257   :  { %v1784_v48 = vpop.eup %1276  ;;  %875 = vadd.xlane.f32.xlu0 %v874_v10  ;;  %v726_v11 = vpop.xlane.xlu0 %725 }
 0x258   :  { %1290 = vpow2.f32 %v814_v16  ;;  %v816_v15 = vmul.f32 1.442695, %v763_v9  ;;  %v768_v13 = vsub.f32 %v1657_v25, %v726_v11  ;;  %v877_v19 = vsel %vm156_vm0, %v1784_v48, 0.0 }
 0x259   :  { %v1789_v54 = vpop.eup %1278  ;;  %v729_v14 = vpop.xlane.xlu1 %728  ;;  %878 = vadd.xlane.f32.xlu1 %v877_v19 }
 0x25a   :  { %1292 = vpow2.f32 %v816_v15  ;;  %v826_v20 = vmul.f32 1.442695, %v768_v13  ;;  %v769_v22 = vsub.f32 %v1667_v35, %v729_v14  ;;  %v892_v28 = vsel %vm156_vm0, %v1789_v54, 0.0 }
 0x25b   :  { %v1794_v53 = vpop.eup %1280  ;;  %893 = vadd.xlane.f32.xlu0 %v892_v28  ;;  %v720_v26 = vpop.xlane.xlu0 %719 }
 0x25c   :  { %1294 = vpow2.f32 %v826_v20  ;;  %v828_v25 = vmul.f32 1.442695, %v769_v22  ;;  %v766_v27 = vsub.f32 %v1664_v34, %v720_v26  ;;  %v895_v31 = vsel %vm156_vm0, %v1794_v53, 0.0 }
 0x25d   :  { %v1799_v57 = vpop.eup %1282  ;;  %v723_v32 = vpop.xlane.xlu1 %722  ;;  %896 = vadd.xlane.f32.xlu1 %v895_v31 }
 0x25e   :  { %1296 = vpow2.f32 %v828_v25  ;;  %v822_v35 = vmul.f32 1.442695, %v766_v27  ;;  %v767_v21 = vsub.f32 %v1672_v39, %v723_v32  ;;  %v886_v40 = vsel %vm156_vm0, %v1799_v57, 0.0 }
 0x25f   :  { %v1804_v60 = vpop.eup %1284  ;;  %887 = vadd.xlane.f32.xlu0 %v886_v40  ;;  %v732_v24 = vpop.xlane.xlu0 %731 }
 0x260   :  { %1298 = vpow2.f32 %v822_v35  ;;  %v824_v34 = vmul.f32 1.442695, %v767_v21  ;;  %v770_v30 = vsub.f32 %v1679_v47, %v732_v24  ;;  %v889_v29 = vsel %vm156_vm0, %v1804_v60, 0.0 }
 0x261   :  { %v1809_v2 = vpop.eup %1286  ;;  %890 = vadd.xlane.f32.xlu1 %v889_v29 }
 0x262   :  { %1300 = vpow2.f32 %v824_v34  ;;  %v830_v46 = vmul.f32 1.442695, %v770_v30  ;;  %v904_v39 = vsel %vm156_vm0, %v1809_v2, 0.0 }
 0x263   :  { %v1813_v33 = vpop.eup %1288  ;;  %v735_v52 = vpop.xlane.xlu1 %734  ;;  %905 = vadd.xlane.f32.xlu0 %v904_v39 }
 0x264   :  { %v738_v1 = vpop.xlane.xlu0 %737  ;;  %1302 = vpow2.f32 %v830_v46  ;;  %v771_v36 = vsub.f32 %v1689_v56, %v735_v52  ;;  %v907_v55 = vsel %vm156_vm0, %v1813_v33, 0.0 }
 0x265   :  { %v772_v47 = vsub.f32 %v1684_v51, %v738_v1  ;;  %v1819_v42 = vpop.eup %1290  ;;  %908 = vadd.xlane.f32.xlu1 %v907_v55 }
 0x266   :  { %v832_v5 = vmul.f32 1.442695, %v771_v36  ;;  %v898_v63 = vsel %vm156_vm0, %v1819_v42, 0.0 }
 0x267   :  { %v834_v62 = vmul.f32 1.442695, %v772_v47  ;;  %v1823_v3 = vpop.eup %1292  ;;  %v741_v8 = vpop.xlane.xlu1 %740  ;;  %899 = vadd.xlane.f32.xlu0 %v898_v63 }
 0x268   :  { %1304 = vpow2.f32 %v832_v5  ;;  %v773_v56 = vsub.f32 %v1692_v58, %v741_v8  ;;  %v901_v51 = vsel %vm156_vm0, %v1823_v3, 0.0 }
 0x269   :  { %v1828_v41 = vpop.eup %1294  ;;  %1306 = vpow2.f32 %v834_v62  ;;  %902 = vadd.xlane.f32.xlu1 %v901_v51 }
 0x26a   :  { %v836_v12 = vmul.f32 1.442695, %v773_v56  ;;  %v916_v7 = vsel %vm156_vm0, %v1828_v41, 0.0 }
 0x26b   :  { %v1832_v16 = vpop.eup %1296  ;;  %917 = vadd.xlane.f32.xlu0 %v916_v7 }
 0x26c   :  { %1308 = vpow2.f32 %v836_v12  ;;  %v919_v9 = vsel %vm156_vm0, %v1832_v16, 0.0 }
 0x26d   :  { %v1836_v10 = vpop.eup %1298  ;;  %920 = vadd.xlane.f32.xlu1 %v919_v9 }
 0x26e   :  { %v910_v58 = vsel %vm156_vm0, %v1836_v10, 0.0 }
 0x26f   :  { %v1840_v11 = vpop.eup %1300  ;;  %911 = vadd.xlane.f32.xlu0 %v910_v58 }
 0x270   :  { %v913_v15 = vsel %vm156_vm0, %v1840_v11, 0.0 }
 0x271   :  { %v1844_v13 = vpop.eup %1302  ;;  %914 = vadd.xlane.f32.xlu1 %v913_v15 }
 0x272   :  { %v922_v19 = vsel %vm156_vm0, %v1844_v13, 0.0 }
 0x273   :  { %923 = vadd.xlane.f32.xlu0 %v922_v19 }
 0x275   :  { %v1848_v14 = vpop.eup %1304 }
 0x276   :  { %v1850_v20 = vpop.eup %1306  ;;  %v925_v22 = vsel %vm156_vm0, %v1848_v14, 0.0 }
 0x277   :  { %926 = vadd.xlane.f32.xlu1 %v925_v22  ;;  %v928_v28 = vsel %vm156_vm0, %v1850_v20, 0.0 }
 0x278   :  { %929 = vadd.xlane.f32.xlu0 %v928_v28 }
 0x279   :  { %v1856_v26 = vpop.eup %1308 }
 0x27a   :  { %v931_v25 = vsel %vm156_vm0, %v1856_v26, 0.0 }
 0x27b   :  { %932 = vadd.xlane.f32.xlu1 %v931_v25 }
 0x2c2   :  { %v846_v27 = vpop.xlane.xlu0 %845 }
 0x2c3   :  { %1310 = vrcp.f32 %v846_v27 }
 0x2c6   :  { %v849_v31 = vpop.xlane.xlu1 %848  ;;  %v840_v32 = vpop.xlane.xlu0 %839 }
 0x2c7   :  { %1312 = vrcp.f32 %v849_v31 }
 0x2c8   :  { %1314 = vrcp.f32 %v840_v32 }
 0x2ca   :  { %v843_v35 = vpop.xlane.xlu1 %842 }
 0x2cb   :  { %1316 = vrcp.f32 %v843_v35 }
 0x2cc   :  { %v858_v21 = vpop.xlane.xlu0 %857 }
 0x2cd   :  { %1318 = vrcp.f32 %v858_v21 }
 0x2ce   :  { %v861_v40 = vpop.xlane.xlu1 %860 }
 0x2cf   :  { %1320 = vrcp.f32 %v861_v40 }
 0x2d0   :  { %v1311_v24 = vpop.eup %1310  ;;  %v852_v34 = vpop.xlane.xlu0 %851 }
 0x2d1   :  { %v939_v30 = vmul.f32 %v1311_v24, %v1708_v37  ;;  %1322 = vrcp.f32 %v852_v34 }
 0x2d2   :  { %v855_v29 = vpop.xlane.xlu1 %854 }
 0x2d3   :  { %1000 = vst.msk [vmem:[%s2025_s5 + $0x10] sm:$0xff] %vm156_vm0, %v939_v30  ;;  %1324 = vrcp.f32 %v855_v29 }
 0x2d4   :  { %v1313_v46 = vpop.eup %1312  ;;  %v870_v39 = vpop.xlane.xlu0 %869 }
 0x2d5   :  { %v1315_v52 = vpop.eup %1314  ;;  %v941_v1 = vmul.f32 %v1313_v46, %v1716_v49  ;;  %1326 = vrcp.f32 %v870_v39 }
 0x2d6   :  { %v935_v36 = vmul.f32 %v1315_v52, %v1713_v43  ;;  %v873_v47 = vpop.xlane.xlu1 %872 }
 0x2d7   :  { %1001 = vst.msk [vmem:[%s2025_s5 + $0x18] sm:$0xff] %vm156_vm0, %v941_v1  ;;  %1328 = vrcp.f32 %v873_v47 }
 0x2d8   :  { %v1317_v37 = vpop.eup %1316  ;;  %998 = vst.msk [vmem:[%s2025_s5] sm:$0xff] %vm156_vm0, %v935_v36  ;;  %v864_v55 = vpop.xlane.xlu0 %863 }
 0x2d9   :  { %v937_v5 = vmul.f32 %v1317_v37, %v1723_v59  ;;  %1330 = vrcp.f32 %v864_v55 }
 0x2da   :  { %v1319_v49 = vpop.eup %1318  ;;  %v867_v62 = vpop.xlane.xlu1 %866 }
 0x2db   :  { %999 = vst.msk [vmem:[%s2025_s5 + $0x8] sm:$0xff] %vm156_vm0, %v937_v5  ;;  %v947_v43 = vmul.f32 %v1319_v49, %v1729_v4  ;;  %1332 = vrcp.f32 %v867_v62 }
 0x2dc   :  { %v1321_v63 = vpop.eup %1320  ;;  %v882_v8 = vpop.xlane.xlu0 %881 }
 0x2dd   :  { %1004 = vst.msk [vmem:[%s2025_s5 + $0x30] sm:$0xff] %vm156_vm0, %v947_v43  ;;  %v949_v59 = vmul.f32 %v1321_v63, %v1734_v45  ;;  %1334 = vrcp.f32 %v882_v8 }
 0x2de   :  { %v1323_v56 = vpop.eup %1322  ;;  %v885_v51 = vpop.xlane.xlu1 %884 }
 0x2df   :  { %1005 = vst.msk [vmem:[%s2025_s5 + $0x38] sm:$0xff] %vm156_vm0, %v949_v59  ;;  %v943_v4 = vmul.f32 %v1323_v56, %v1739_v17  ;;  %1336 = vrcp.f32 %v885_v51 }
 0x2e0   :  { %v1325_v12 = vpop.eup %1324  ;;  %v876_v7 = vpop.xlane.xlu0 %875 }
 0x2e1   :  { %1002 = vst.msk [vmem:[%s2025_s5 + $0x20] sm:$0xff] %vm156_vm0, %v943_v4  ;;  %v945_v45 = vmul.f32 %v1325_v12, %v1744_v23  ;;  %1338 = vrcp.f32 %v876_v7 }
 0x2e2   :  { %v1327_v9 = vpop.eup %1326  ;;  %v879_v58 = vpop.xlane.xlu1 %878 }
 0x2e3   :  { %1003 = vst.msk [vmem:[%s2025_s5 + $0x28] sm:$0xff] %vm156_vm0, %v945_v45  ;;  %v955_v17 = vmul.f32 %v1327_v9, %v1749_v18  ;;  %1340 = vrcp.f32 %v879_v58 }
 0x2e4   :  { %v1329_v15 = vpop.eup %1328  ;;  %v894_v19 = vpop.xlane.xlu0 %893 }
 0x2e5   :  { %1008 = vst.msk [vmem:[%s2025_s5 + $0x50] sm:$0xff] %vm156_vm0, %v955_v17  ;;  %v957_v23 = vmul.f32 %v1329_v15, %v1754_v38  ;;  %1342 = vrcp.f32 %v894_v19 }
 0x2e6   :  { %v1331_v22 = vpop.eup %1330  ;;  %v897_v28 = vpop.xlane.xlu1 %896 }
 0x2e7   :  { %1009 = vst.msk [vmem:[%s2025_s5 + $0x58] sm:$0xff] %vm156_vm0, %v957_v23  ;;  %v951_v18 = vmul.f32 %v1331_v22, %v1759_v44  ;;  %1344 = vrcp.f32 %v897_v28 }
 0x2e8   :  { %v1333_v25 = vpop.eup %1332  ;;  %v888_v27 = vpop.xlane.xlu0 %887 }
 0x2e9   :  { %1006 = vst.msk [vmem:[%s2025_s5 + $0x40] sm:$0xff] %vm156_vm0, %v951_v18  ;;  %v953_v38 = vmul.f32 %v1333_v25, %v1764_v50  ;;  %1346 = vrcp.f32 %v888_v27 }
 0x2ea   :  { %v1335_v31 = vpop.eup %1334  ;;  %v891_v32 = vpop.xlane.xlu1 %890 }
 0x2eb   :  { %1007 = vst.msk [vmem:[%s2025_s5 + $0x48] sm:$0xff] %vm156_vm0, %v953_v38  ;;  %v963_v44 = vmul.f32 %v1335_v31, %v1769_v61  ;;  %1348 = vrcp.f32 %v891_v32 }
 0x2ec   :  { %v1337_v35 = vpop.eup %1336  ;;  %v906_v21 = vpop.xlane.xlu0 %905 }
 0x2ed   :  { %1012 = vst.msk [vmem:[%s2025_s5 + $0x70] sm:$0xff] %vm156_vm0, %v963_v44  ;;  %v965_v50 = vmul.f32 %v1337_v35, %v1774_v0  ;;  %1350 = vrcp.f32 %v906_v21 }
 0x2ee   :  { %v1339_v40 = vpop.eup %1338  ;;  %v909_v24 = vpop.xlane.xlu1 %908 }
 0x2ef   :  { %1013 = vst.msk [vmem:[%s2025_s5 + $0x78] sm:$0xff] %vm156_vm0, %v965_v50  ;;  %v959_v61 = vmul.f32 %v1339_v40, %v1779_v6  ;;  %1352 = vrcp.f32 %v909_v24 }
 0x2f0   :  { %v1341_v34 = vpop.eup %1340  ;;  %v900_v30 = vpop.xlane.xlu0 %899 }
 0x2f1   :  { %1010 = vst.msk [vmem:[%s2025_s5 + $0x60] sm:$0xff] %vm156_vm0, %v959_v61  ;;  %v961_v0 = vmul.f32 %v1341_v34, %v1784_v48  ;;  %1354 = vrcp.f32 %v900_v30 }
 0x2f2   :  { %v1343_v29 = vpop.eup %1342  ;;  %v903_v46 = vpop.xlane.xlu1 %902 }
 0x2f3   :  { %1011 = vst.msk [vmem:[%s2025_s5 + $0x68] sm:$0xff] %vm156_vm0, %v961_v0  ;;  %v971_v6 = vmul.f32 %v1343_v29, %v1789_v54  ;;  %1356 = vrcp.f32 %v903_v46 }
 0x2f4   :  { %v1345_v39 = vpop.eup %1344  ;;  %v918_v52 = vpop.xlane.xlu0 %917 }
 0x2f5   :  { %1016 = vst.msk [vmem:[%s2025_s5 + $0x90] sm:$0xff] %vm156_vm0, %v971_v6  ;;  %v973_v48 = vmul.f32 %v1345_v39, %v1794_v53  ;;  %1358 = vrcp.f32 %v918_v52 }
 0x2f6   :  { %v1347_v1 = vpop.eup %1346  ;;  %v921_v36 = vpop.xlane.xlu1 %920 }
 0x2f7   :  { %1017 = vst.msk [vmem:[%s2025_s5 + $0x98] sm:$0xff] %vm156_vm0, %v973_v48  ;;  %v967_v54 = vmul.f32 %v1347_v1, %v1799_v57  ;;  %1360 = vrcp.f32 %v921_v36 }
 0x2f8   :  { %v1349_v47 = vpop.eup %1348  ;;  %v912_v37 = vpop.xlane.xlu0 %911 }
 0x2f9   :  { %1014 = vst.msk [vmem:[%s2025_s5 + $0x80] sm:$0xff] %vm156_vm0, %v967_v54  ;;  %v969_v53 = vmul.f32 %v1349_v47, %v1804_v60  ;;  %1362 = vrcp.f32 %v912_v37 }
 0x2fa   :  { %v1351_v55 = vpop.eup %1350  ;;  %v915_v5 = vpop.xlane.xlu1 %914 }
 0x2fb   :  { %1015 = vst.msk [vmem:[%s2025_s5 + $0x88] sm:$0xff] %vm156_vm0, %v969_v53  ;;  %v979_v57 = vmul.f32 %v1351_v55, %v1809_v2  ;;  %1364 = vrcp.f32 %v915_v5 }
 0x2fc   :  { %v1353_v49 = vpop.eup %1352  ;;  %v924_v62 = vpop.xlane.xlu0 %923 }
 0x2fd   :  { %1020 = vst.msk [vmem:[%s2025_s5 + $0xb0] sm:$0xff] %vm156_vm0, %v979_v57  ;;  %v981_v60 = vmul.f32 %v1353_v49, %v1813_v33  ;;  %1366 = vrcp.f32 %v924_v62 }
 0x2fe   :  { %v1355_v43 = vpop.eup %1354 }
 0x2ff   :  { %1021 = vst.msk [vmem:[%s2025_s5 + $0xb8] sm:$0xff] %vm156_vm0, %v981_v60  ;;  %v975_v63 = vmul.f32 %v1355_v43, %v1819_v42 }
 0x300   :  { %v1357_v2 = vpop.eup %1356  ;;  %v927_v8 = vpop.xlane.xlu1 %926 }
 0x301   :  { %1018 = vst.msk [vmem:[%s2025_s5 + $0xa0] sm:$0xff] %vm156_vm0, %v975_v63  ;;  %v977_v59 = vmul.f32 %v1357_v2, %v1823_v3  ;;  %1368 = vrcp.f32 %v927_v8  ;;  %v930_v33 = vpop.xlane.xlu0 %929 }
 0x302   :  { %v1359_v56 = vpop.eup %1358  ;;  %1370 = vrcp.f32 %v930_v33 }
 0x303   :  { %1019 = vst.msk [vmem:[%s2025_s5 + $0xa8] sm:$0xff] %vm156_vm0, %v977_v59  ;;  %v987_v42 = vmul.f32 %v1359_v56, %v1828_v41 }
 0x304   :  { %v1361_v51 = vpop.eup %1360  ;;  %v933_v4 = vpop.xlane.xlu1 %932 }
 0x305   :  { %1024 = vst.msk [vmem:[%s2025_s5 + $0xd0] sm:$0xff] %vm156_vm0, %v987_v42  ;;  %v989_v3 = vmul.f32 %v1361_v51, %v1832_v16  ;;  %1372 = vrcp.f32 %v933_v4 }
 0x306   :  { %v1363_v12 = vpop.eup %1362 }
 0x307   :  { %1025 = vst.msk [vmem:[%s2025_s5 + $0xd8] sm:$0xff] %vm156_vm0, %v989_v3  ;;  %v983_v7 = vmul.f32 %v1363_v12, %v1836_v10 }
 0x308   :  { %v1365_v45 = vpop.eup %1364 }
 0x309   :  { %1022 = vst.msk [vmem:[%s2025_s5 + $0xc0] sm:$0xff] %vm156_vm0, %v983_v7  ;;  %v985_v41 = vmul.f32 %v1365_v45, %v1840_v11 }
 0x30a   :  { %v1367_v9 = vpop.eup %1366 }
 0x30b   :  { %1023 = vst.msk [vmem:[%s2025_s5 + $0xc8] sm:$0xff] %vm156_vm0, %v985_v41  ;;  %v991_v16 = vmul.f32 %v1367_v9, %v1844_v13 }
 0x30d   :  { %1026 = vst.msk [vmem:[%s2025_s5 + $0xe0] sm:$0xff] %vm156_vm0, %v991_v16 }
 0x30e   :  { %v1369_v10 = vpop.eup %1368 }
 0x30f   :  { %v1371_v58 = vpop.eup %1370  ;;  %v993_v17 = vmul.f32 %v1369_v10, %v1848_v14 }
 0x310   :  { %v995_v15 = vmul.f32 %v1371_v58, %v1850_v20 }
 0x311   :  { %1027 = vst.msk [vmem:[%s2025_s5 + $0xe8] sm:$0xff] %vm156_vm0, %v993_v17 }
 0x312   :  { %v1373_v11 = vpop.eup %1372  ;;  %1028 = vst.msk [vmem:[%s2025_s5 + $0xf0] sm:$0xff] %vm156_vm0, %v995_v15 }
 0x313   :  { %v997_v13 = vmul.f32 %v1373_v11, %v1856_v26 }
 0x315   :  { %1029 = vst.msk [vmem:[%s2025_s5 + $0xf8] sm:$0xff] %vm156_vm0, %v997_v13 }

</bundles_post_ra>
